<compile_context>
chip_gen: v5e
topology: v5e:2x2
jax: 0.10.0
libtpu: 0.0.40
codegen_flags: <defaults>
</compile_context>

<pallas_src>
import functools
import math

import jax
import jax.numpy as jnp
from jax import lax
from jax.experimental import pallas as pl
from jax.experimental.pallas import tpu as pltpu

COMPUTE_DTYPE = jnp.bfloat16   # MXU operand dtype; accumulation is always f32.


# ----------------------------- kernel helpers ------------------------------

def _layer_norm(h):
    # nn.LayerNorm(d_model) with default params (gamma=1, beta=0, eps=1e-5,
    # biased variance).  Kept in f32.
    mean = jnp.mean(h, axis=-1, keepdims=True)
    var = jnp.mean((h - mean) * (h - mean), axis=-1, keepdims=True)
    return (h - mean) * lax.rsqrt(var + 1e-5)


def fused_encoder_kernel(x_ref, bias_ref, wqkv_ref, wo_ref, w1_ref, w2_ref,
                         y_ref, attn_ref, ctx_ref, *, n_head):
    """One grid step == one full EncoderLayer over one (batch-block, seq) slab."""
    l = pl.program_id(1)

    # Layer 0: seed the VMEM-resident carried activation (the y output block).
    @pl.when(l == 0)
    def _():
        y_ref[...] = x_ref[...]

    B, S, D = y_ref.shape
    d_k = D // n_head
    cdt = COMPUTE_DTYPE

    h_res = y_ref[...]                                   # (B, S, D) f32, resident
    h2 = h_res.reshape(B * S, D).astype(cdt)

    # --- fused Q/K/V projection: ONE MXU pass, lane width 3*D -----------------
    # (1/sqrt(d_k) already folded into the Q columns wrapper-side)
    qkv = jnp.dot(h2, wqkv_ref[0], preferred_element_type=jnp.float32)  # (B*S, 3D)
    qkv = qkv.reshape(B, S, 3 * D)

    bias = bias_ref[...]                                 # (B, 1, S) additive pad bias

    # --- per-head scaled-dot-product attention (d_k contraction is inherent) --
    for hh in range(n_head):
        def head_slice(group):
            off = group * D + hh * d_k
            return qkv[:, :, off:off + d_k].astype(cdt)  # (B, S, d_k)

        q_h, k_h, v_h = head_slice(0), head_slice(1), head_slice(2)

        s_h = jnp.einsum('bqd,bkd->bqk', q_h, k_h,
                         preferred_element_type=jnp.float32)   # (B, S, S)
        s_h = s_h + bias                                        # pad keys -> -1e9

        m = jnp.max(s_h, axis=-1, keepdims=True)
        e = jnp.exp(s_h - m)
        p_h = e / jnp.sum(e, axis=-1, keepdims=True)            # exact softmax (f32)

        attn_ref[0, :, hh] = p_h                                # batch-major layout

        c_h = jnp.einsum('bqk,bkd->bqd', p_h.astype(cdt), v_h,
                         preferred_element_type=jnp.float32)    # (B, S, d_k)
        # write this head's context into its lane slot of the fused context slab
        ctx_ref[:, hh * d_k:(hh + 1) * d_k] = c_h.reshape(B * S, d_k).astype(cdt)

    # --- concat(heads) @ W_O as ONE (B*S, D) @ (D, D) matmul ------------------
    attn_out = jnp.dot(ctx_ref[...], wo_ref[0], preferred_element_type=jnp.float32)
    h1 = _layer_norm(attn_out + h_res.reshape(B * S, D))        # residual + LN

    # --- position-wise feed-forward -------------------------------------------
    ff = jnp.dot(h1.astype(cdt), w1_ref[0], preferred_element_type=jnp.float32)
    ff = jnp.maximum(ff, 0.0)                                   # ReLU
    ff = jnp.dot(ff.astype(cdt), w2_ref[0], preferred_element_type=jnp.float32)
    out = _layer_norm(ff + h1).reshape(B, S, D)                 # residual + LN

    y_ref[...] = out                                            # carry to next layer


# ------------------------------- wrapper ------------------------------------

def _stack_layer_params(layers, n_head, d_k):
    """Stack per-layer weights with a leading L axis; fuse Q/K/V columns."""
    scale = 1.0 / math.sqrt(d_k)
    wqkv_l, wo_l, w1_l, w2_l = [], [], [], []
    for wq, wk, wv, wo, w1, w2 in layers:
        wqkv_l.append(jnp.concatenate([wq * scale, wk, wv], axis=1))  # (D, 3*H*d_k)
        wo_l.append(wo)                                               # (H*d_k, D)
        w1_l.append(w1)
        w2_l.append(w2)
    stk = lambda xs: jnp.stack(xs).astype(COMPUTE_DTYPE)
    return stk(wqkv_l), stk(wo_l), stk(w1_l), stk(w2_l)


def sinusoidal_pe(seq_len, d_model):
    pos = jnp.arange(seq_len, dtype=jnp.float32)[:, None]
    i = jnp.arange(d_model)[None, :]
    div = jnp.power(10000.0, (2.0 * (i // 2).astype(jnp.float32)) / d_model)
    angle = pos / div
    return jnp.where(i % 2 == 0, jnp.sin(angle), jnp.cos(angle))


def init_params(key, vocab_size, d_model, n_head, n_layers, d_ff):
    d_k = d_model // n_head
    keys = jax.random.split(key, 1 + 6 * n_layers)
    emb = jax.random.normal(keys[0], (vocab_size, d_model), jnp.float32) * 0.1
    layers = []
    for l in range(n_layers):
        ks = keys[1 + 6 * l: 1 + 6 * (l + 1)]
        wq = jax.random.normal(ks[0], (d_model, n_head * d_k), jnp.float32) * 0.1
        wk = jax.random.normal(ks[1], (d_model, n_head * d_k), jnp.float32) * 0.1
        wv = jax.random.normal(ks[2], (d_model, n_head * d_k), jnp.float32) * 0.1
        wo = jax.random.normal(ks[3], (n_head * d_k, d_model), jnp.float32) * 0.1
        w1 = jax.random.normal(ks[4], (d_model, d_ff), jnp.float32) * 0.1
        w2 = jax.random.normal(ks[5], (d_ff, d_model), jnp.float32) * 0.1
        layers.append((wq, wk, wv, wo, w1, w2))
    return emb, layers


def encoder_forward(tokens, emb, layers, n_head):
    """tokens: (B, S) int32 -> (enc_outputs (B, S, D), [attn (B, H, S, S) per layer])."""
    B, S = tokens.shape
    D = emb.shape[1]
    d_k = D // n_head
    L = len(layers)

    # Embedding + sinusoidal positional encoding (plain-JAX glue).
    x = jnp.take(emb, tokens, axis=0) + sinusoidal_pe(S, D)[None, :, :]
    # TODO(synk): PositionalEncoding dropout omitted (eval-mode semantics).

    # Additive pad bias: -1e9 at PAD keys (O(S) per batch element), broadcast in-kernel.
    pad_bias = jnp.where(tokens == 0, -1e9, 0.0).astype(jnp.float32).reshape(B, 1, S)

    wqkv, wo, w1, w2 = _stack_layer_params(layers, n_head, d_k)
    d_ff = w1.shape[-1]

    # Split batch across grid blocks (parallel axis -> v7x megacore); layers sequential.
    batch_blocks = 2 if B % 2 == 0 else 1
    bb = B // batch_blocks

    kernel = functools.partial(fused_encoder_kernel, n_head=n_head)
    per_batch3 = lambda bi, l: (bi, 0, 0)
    per_layer3 = lambda bi, l: (l, 0, 0)

    y, attn_all = pl.pallas_call(
        kernel,
        out_shape=(jax.ShapeDtypeStruct((B, S, D), jnp.float32),
                   jax.ShapeDtypeStruct((L, B, n_head, S, S), jnp.float32)),
        grid=(batch_blocks, L),
        in_specs=[
            pl.BlockSpec((bb, S, D), per_batch3),          # embedded inputs (layer 0 seed)
            pl.BlockSpec((bb, 1, S), per_batch3),          # additive key-pad bias
            pl.BlockSpec((1, D, 3 * D), per_layer3),       # fused W_QKV (Q pre-scaled)
            pl.BlockSpec((1, D, D), per_layer3),           # W_O
            pl.BlockSpec((1, D, d_ff), per_layer3),        # FFN W1
            pl.BlockSpec((1, d_ff, D), per_layer3),        # FFN W2
        ],
        out_specs=(
            pl.BlockSpec((bb, S, D), per_batch3),          # carried activation / final out
            pl.BlockSpec((1, bb, n_head, S, S),
                         lambda bi, l: (l, bi, 0, 0, 0)),  # attn probs, batch-major
        ),
        scratch_shapes=[pltpu.VMEM((bb * S, D), COMPUTE_DTYPE)],   # fused head context
        compiler_params=pltpu.CompilerParams(
            dimension_semantics=("parallel", "arbitrary")),
    )(x, pad_bias, wqkv, wo, w1, w2)

    # Already (L, B, H, S, S): per-layer views need no transpose / HBM pass.
    return y, [attn_all[l] for l in range(L)]


# --------------------------------- main --------------------------------------

if __name__ == "__main__":
    vocab_size, d_model, n_head, n_layers, d_ff = 16, 32, 4, 2, 64
    batch, seq_len = 2, 8

    key = jax.random.PRNGKey(0)
    k_tok, k_par = jax.random.split(key)
    tokens = jax.random.randint(k_tok, (batch, seq_len), 1, vocab_size,
                                dtype=jnp.int32)
    tokens = tokens.at[0, -2:].set(0)      # add some PAD tokens (id 0)
    tokens = tokens.at[1, -1:].set(0)

    emb, layers = init_params(k_par, vocab_size, d_model, n_head, n_layers, d_ff)

    enc_out, enc_attns = encoder_forward(tokens, emb, layers, n_head)
    jax.block_until_ready(enc_out)
    for a in enc_attns:
        jax.block_until_ready(a)

    assert enc_out.shape == (batch, seq_len, d_model)
    assert len(enc_attns) == n_layers
    assert enc_attns[0].shape == (batch, n_head, seq_len, seq_len)
    assert bool(jnp.isfinite(enc_out).all())
    assert bool(jnp.isfinite(enc_attns[0]).all())
    print("KERNEL_OK")
</pallas_src>

<mosaic_0001>
module attributes {stable_mosaic.version = 11 : i64} {
  func.func @fused_encoder_kernel(%arg0: i32, %arg1: i32, %arg2: memref<1x8x32xf32, #tpu.memory_space<vmem>>, %arg3: memref<1x1x8xf32, #tpu.memory_space<vmem>>, %arg4: memref<1x32x96xbf16, #tpu.memory_space<vmem>>, %arg5: memref<1x32x32xbf16, #tpu.memory_space<vmem>>, %arg6: memref<1x32x64xbf16, #tpu.memory_space<vmem>>, %arg7: memref<1x64x32xbf16, #tpu.memory_space<vmem>>, %arg8: memref<1x8x32xf32, #tpu.memory_space<vmem>>, %arg9: memref<1x1x4x8x8xf32, #tpu.memory_space<vmem>>, %arg10: memref<8x32xbf16, #tpu.memory_space<vmem>>) attributes {dimension_semantics = [#tpu.dimension_semantics<parallel>, #tpu.dimension_semantics<arbitrary>], iteration_bounds = array<i64: 2, 2>, scalar_prefetch = 0 : i64, scratch_operands = 1 : i64, tpu.core_type = #tpu.core_type<tc>, window_params = [{transform_indices = @transform_0, window_bounds = array<i64: 1, 8, 32>}, {transform_indices = @transform_1, window_bounds = array<i64: 1, 1, 8>}, {transform_indices = @transform_2, window_bounds = array<i64: 1, 32, 96>}, {transform_indices = @transform_3, window_bounds = array<i64: 1, 32, 32>}, {transform_indices = @transform_4, window_bounds = array<i64: 1, 32, 64>}, {transform_indices = @transform_5, window_bounds = array<i64: 1, 64, 32>}, {transform_indices = @transform_6, window_bounds = array<i64: 1, 8, 32>}, {transform_indices = @transform_7, window_bounds = array<i64: 1, 1, 4, 8, 8>}]} {
    %c0_i32 = arith.constant 0 : i32
    %0 = arith.cmpi eq, %arg1, %c0_i32 : i32
    %1 = arith.extui %0 : i1 to i32
    %c0_i32_0 = arith.constant 0 : i32
    %2 = arith.cmpi ne, %1, %c0_i32_0 : i32
    scf.if %2 {
      %c0_75 = arith.constant 0 : index
      %c0_76 = arith.constant 0 : index
      %c0_77 = arith.constant 0 : index
      %174 = vector.load %arg2[%c0_75, %c0_76, %c0_77] : memref<1x8x32xf32, #tpu.memory_space<vmem>>, vector<1x8x32xf32>
      %c0_78 = arith.constant 0 : index
      %c0_79 = arith.constant 0 : index
      %c0_80 = arith.constant 0 : index
      %175 = vector.load %arg8[%c0_78, %c0_79, %c0_80] : memref<1x8x32xf32, #tpu.memory_space<vmem>>, vector<1x8x32xf32>
      tpu.vector_store %arg8[%c0_78, %c0_79, %c0_80], %174 {strides = array<i32>} : memref<1x8x32xf32, #tpu.memory_space<vmem>>, vector<1x8x32xf32>,
    } else {
    }
    %c0 = arith.constant 0 : index
    %c0_1 = arith.constant 0 : index
    %c0_2 = arith.constant 0 : index
    %3 = vector.load %arg8[%c0, %c0_1, %c0_2] : memref<1x8x32xf32, #tpu.memory_space<vmem>>, vector<1x8x32xf32>
    %4 = vector.shape_cast %3 : vector<1x8x32xf32> to vector<8x32xf32>
    %5 = arith.truncf %4 : vector<8x32xf32> to vector<8x32xbf16>
    %c0_3 = arith.constant 0 : index
    %c0_4 = arith.constant 0 : index
    %c0_5 = arith.constant 0 : index
    %6 = vector.load %arg4[%c0_3, %c0_4, %c0_5] : memref<1x32x96xbf16, #tpu.memory_space<vmem>>, vector<1x32x96xbf16>
    %7 = vector.shape_cast %6 : vector<1x32x96xbf16> to vector<32x96xbf16>
    %cst = arith.constant dense<0.000000e+00> : vector<8x96xf32>
    %8 = tpu.matmul %5, %7, %cst {dimension_numbers = #tpu.dot_dimension_numbers<[1], [0], [0], [1], [0, 0, 1, 1], [], []>} : vector<8x32xbf16>, vector<32x96xbf16>, vector<8x96xf32> -> vector<8x96xf32>
    %9 = vector.shape_cast %8 : vector<8x96xf32> to vector<1x8x96xf32>
    %c0_6 = arith.constant 0 : index
    %c0_7 = arith.constant 0 : index
    %c0_8 = arith.constant 0 : index
    %10 = vector.load %arg3[%c0_6, %c0_7, %c0_8] : memref<1x1x8xf32, #tpu.memory_space<vmem>>, vector<1x1x8xf32>
    %11 = vector.extract_strided_slice %9 {offsets = [0, 0, 0], sizes = [1, 8, 8], strides = [1, 1, 1]} : vector<1x8x96xf32> to vector<1x8x8xf32>
    %12 = arith.truncf %11 : vector<1x8x8xf32> to vector<1x8x8xbf16>
    %13 = vector.extract_strided_slice %9 {offsets = [0, 0, 32], sizes = [1, 8, 8], strides = [1, 1, 1]} : vector<1x8x96xf32> to vector<1x8x8xf32>
    %14 = arith.truncf %13 : vector<1x8x8xf32> to vector<1x8x8xbf16>
    %15 = vector.extract_strided_slice %9 {offsets = [0, 0, 64], sizes = [1, 8, 8], strides = [1, 1, 1]} : vector<1x8x96xf32> to vector<1x8x8xf32>
    %16 = arith.truncf %15 : vector<1x8x8xf32> to vector<1x8x8xbf16>
    "tpu.trace_start"() <{level = 10 : i32, message = "bqd,bkd->bqk"}> : () -> ()
    %cst_9 = arith.constant dense<0.000000e+00> : vector<1x8x8xf32>
    %17 = tpu.matmul %12, %14, %cst_9 {dimension_numbers = #tpu.dot_dimension_numbers<[2], [2], [1], [1], [0, 0, 0, 1, 1, 1], [0], [0]>} : vector<1x8x8xbf16>, vector<1x8x8xbf16>, vector<1x8x8xf32> -> vector<1x8x8xf32>
    "tpu.trace_stop"() : () -> ()
    %18 = vector.broadcast %10 : vector<1x1x8xf32> to vector<1x8x8xf32>
    %19 = arith.addf %17, %18 : vector<1x8x8xf32>
    %cst_10 = arith.constant dense<0xFF800000> : vector<1x8xf32>
    %20 = vector.multi_reduction <maximumf>, %19, %cst_10 [2] : vector<1x8x8xf32> to vector<1x8xf32>
    %21 = vector.shape_cast %20 : vector<1x8xf32> to vector<1x8x1xf32>
    %22 = vector.broadcast %21 : vector<1x8x1xf32> to vector<1x8x8xf32>
    %23 = arith.subf %19, %22 : vector<1x8x8xf32>
    %24 = math.exp %23 : vector<1x8x8xf32>
    %cst_11 = arith.constant dense<0.000000e+00> : vector<1x8xf32>
    %25 = vector.multi_reduction <add>, %24, %cst_11 [2] : vector<1x8x8xf32> to vector<1x8xf32>
    %26 = vector.shape_cast %25 : vector<1x8xf32> to vector<1x8x1xf32>
    %27 = vector.broadcast %26 : vector<1x8x1xf32> to vector<1x8x8xf32>
    %28 = arith.divf %24, %27 : vector<1x8x8xf32>
    %c0_12 = arith.constant 0 : index
    %c0_13 = arith.constant 0 : index
    %c0_14 = arith.constant 0 : index
    %c0_15 = arith.constant 0 : index
    %c0_16 = arith.constant 0 : index
    %29 = vector.load %arg9[%c0_12, %c0_13, %c0_14, %c0_15, %c0_16] : memref<1x1x4x8x8xf32, #tpu.memory_space<vmem>>, vector<1x1x1x8x8xf32>
    %30 = vector.shape_cast %29 : vector<1x1x1x8x8xf32> to vector<1x8x8xf32>
    %31 = vector.shape_cast %28 : vector<1x8x8xf32> to vector<1x1x1x8x8xf32>
    tpu.vector_store %arg9[%c0_12, %c0_13, %c0_14, %c0_15, %c0_16], %31 {strides = array<i32>} : memref<1x1x4x8x8xf32, #tpu.memory_space<vmem>>, vector<1x1x1x8x8xf32>,
    %32 = arith.truncf %28 : vector<1x8x8xf32> to vector<1x8x8xbf16>
    "tpu.trace_start"() <{level = 10 : i32, message = "bqk,bkd->bqd"}> : () -> ()
    %cst_17 = arith.constant dense<0.000000e+00> : vector<1x8x8xf32>
    %33 = tpu.matmul %32, %16, %cst_17 {dimension_numbers = #tpu.dot_dimension_numbers<[2], [1], [1], [2], [0, 0, 0, 1, 1, 2], [0], [0]>} : vector<1x8x8xbf16>, vector<1x8x8xbf16>, vector<1x8x8xf32> -> vector<1x8x8xf32>
    "tpu.trace_stop"() : () -> ()
    %34 = vector.shape_cast %33 : vector<1x8x8xf32> to vector<8x8xf32>
    %35 = arith.truncf %34 : vector<8x8xf32> to vector<8x8xbf16>
    %c0_18 = arith.constant 0 : index
    %c0_19 = arith.constant 0 : index
    %36 = vector.load %arg10[%c0_18, %c0_19] : memref<8x32xbf16, #tpu.memory_space<vmem>>, vector<8x8xbf16>
    tpu.vector_store %arg10[%c0_18, %c0_19], %35 {strides = array<i32>} : memref<8x32xbf16, #tpu.memory_space<vmem>>, vector<8x8xbf16>,
    %37 = vector.extract_strided_slice %9 {offsets = [0, 0, 8], sizes = [1, 8, 8], strides = [1, 1, 1]} : vector<1x8x96xf32> to vector<1x8x8xf32>
    %38 = arith.truncf %37 : vector<1x8x8xf32> to vector<1x8x8xbf16>
    %39 = vector.extract_strided_slice %9 {offsets = [0, 0, 40], sizes = [1, 8, 8], strides = [1, 1, 1]} : vector<1x8x96xf32> to vector<1x8x8xf32>
    %40 = arith.truncf %39 : vector<1x8x8xf32> to vector<1x8x8xbf16>
    %41 = vector.extract_strided_slice %9 {offsets = [0, 0, 72], sizes = [1, 8, 8], strides = [1, 1, 1]} : vector<1x8x96xf32> to vector<1x8x8xf32>
    %42 = arith.truncf %41 : vector<1x8x8xf32> to vector<1x8x8xbf16>
    "tpu.trace_start"() <{level = 10 : i32, message = "bqd,bkd->bqk"}> : () -> ()
    %cst_20 = arith.constant dense<0.000000e+00> : vector<1x8x8xf32>
    %43 = tpu.matmul %38, %40, %cst_20 {dimension_numbers = #tpu.dot_dimension_numbers<[2], [2], [1], [1], [0, 0, 0, 1, 1, 1], [0], [0]>} : vector<1x8x8xbf16>, vector<1x8x8xbf16>, vector<1x8x8xf32> -> vector<1x8x8xf32>
    "tpu.trace_stop"() : () -> ()
    %44 = vector.broadcast %10 : vector<1x1x8xf32> to vector<1x8x8xf32>
    %45 = arith.addf %43, %44 : vector<1x8x8xf32>
    %cst_21 = arith.constant dense<0xFF800000> : vector<1x8xf32>
    %46 = vector.multi_reduction <maximumf>, %45, %cst_21 [2] : vector<1x8x8xf32> to vector<1x8xf32>
    %47 = vector.shape_cast %46 : vector<1x8xf32> to vector<1x8x1xf32>
    %48 = vector.broadcast %47 : vector<1x8x1xf32> to vector<1x8x8xf32>
    %49 = arith.subf %45, %48 : vector<1x8x8xf32>
    %50 = math.exp %49 : vector<1x8x8xf32>
    %cst_22 = arith.constant dense<0.000000e+00> : vector<1x8xf32>
    %51 = vector.multi_reduction <add>, %50, %cst_22 [2] : vector<1x8x8xf32> to vector<1x8xf32>
    %52 = vector.shape_cast %51 : vector<1x8xf32> to vector<1x8x1xf32>
    %53 = vector.broadcast %52 : vector<1x8x1xf32> to vector<1x8x8xf32>
    %54 = arith.divf %50, %53 : vector<1x8x8xf32>
    %c0_23 = arith.constant 0 : index
    %c0_24 = arith.constant 0 : index
    %c1 = arith.constant 1 : index
    %c0_25 = arith.constant 0 : index
    %c0_26 = arith.constant 0 : index
    %55 = vector.load %arg9[%c0_23, %c0_24, %c1, %c0_25, %c0_26] : memref<1x1x4x8x8xf32, #tpu.memory_space<vmem>>, vector<1x1x1x8x8xf32>
    %56 = vector.shape_cast %55 : vector<1x1x1x8x8xf32> to vector<1x8x8xf32>
    %57 = vector.shape_cast %54 : vector<1x8x8xf32> to vector<1x1x1x8x8xf32>
    tpu.vector_store %arg9[%c0_23, %c0_24, %c1, %c0_25, %c0_26], %57 {strides = array<i32>} : memref<1x1x4x8x8xf32, #tpu.memory_space<vmem>>, vector<1x1x1x8x8xf32>,
    %58 = arith.truncf %54 : vector<1x8x8xf32> to vector<1x8x8xbf16>
    "tpu.trace_start"() <{level = 10 : i32, message = "bqk,bkd->bqd"}> : () -> ()
    %cst_27 = arith.constant dense<0.000000e+00> : vector<1x8x8xf32>
    %59 = tpu.matmul %58, %42, %cst_27 {dimension_numbers = #tpu.dot_dimension_numbers<[2], [1], [1], [2], [0, 0, 0, 1, 1, 2], [0], [0]>} : vector<1x8x8xbf16>, vector<1x8x8xbf16>, vector<1x8x8xf32> -> vector<1x8x8xf32>
    "tpu.trace_stop"() : () -> ()
    %60 = vector.shape_cast %59 : vector<1x8x8xf32> to vector<8x8xf32>
    %61 = arith.truncf %60 : vector<8x8xf32> to vector<8x8xbf16>
    %c0_28 = arith.constant 0 : index
    %c8 = arith.constant 8 : index
    %62 = vector.load %arg10[%c0_28, %c8] : memref<8x32xbf16, #tpu.memory_space<vmem>>, vector<8x8xbf16>
    tpu.vector_store %arg10[%c0_28, %c8], %61 {strides = array<i32>} : memref<8x32xbf16, #tpu.memory_space<vmem>>, vector<8x8xbf16>,
    %63 = vector.extract_strided_slice %9 {offsets = [0, 0, 16], sizes = [1, 8, 8], strides = [1, 1, 1]} : vector<1x8x96xf32> to vector<1x8x8xf32>
    %64 = arith.truncf %63 : vector<1x8x8xf32> to vector<1x8x8xbf16>
    %65 = vector.extract_strided_slice %9 {offsets = [0, 0, 48], sizes = [1, 8, 8], strides = [1, 1, 1]} : vector<1x8x96xf32> to vector<1x8x8xf32>
    %66 = arith.truncf %65 : vector<1x8x8xf32> to vector<1x8x8xbf16>
    %67 = vector.extract_strided_slice %9 {offsets = [0, 0, 80], sizes = [1, 8, 8], strides = [1, 1, 1]} : vector<1x8x96xf32> to vector<1x8x8xf32>
    %68 = arith.truncf %67 : vector<1x8x8xf32> to vector<1x8x8xbf16>
    "tpu.trace_start"() <{level = 10 : i32, message = "bqd,bkd->bqk"}> : () -> ()
    %cst_29 = arith.constant dense<0.000000e+00> : vector<1x8x8xf32>
    %69 = tpu.matmul %64, %66, %cst_29 {dimension_numbers = #tpu.dot_dimension_numbers<[2], [2], [1], [1], [0, 0, 0, 1, 1, 1], [0], [0]>} : vector<1x8x8xbf16>, vector<1x8x8xbf16>, vector<1x8x8xf32> -> vector<1x8x8xf32>
    "tpu.trace_stop"() : () -> ()
    %70 = vector.broadcast %10 : vector<1x1x8xf32> to vector<1x8x8xf32>
    %71 = arith.addf %69, %70 : vector<1x8x8xf32>
    %cst_30 = arith.constant dense<0xFF800000> : vector<1x8xf32>
    %72 = vector.multi_reduction <maximumf>, %71, %cst_30 [2] : vector<1x8x8xf32> to vector<1x8xf32>
    %73 = vector.shape_cast %72 : vector<1x8xf32> to vector<1x8x1xf32>
    %74 = vector.broadcast %73 : vector<1x8x1xf32> to vector<1x8x8xf32>
    %75 = arith.subf %71, %74 : vector<1x8x8xf32>
    %76 = math.exp %75 : vector<1x8x8xf32>
    %cst_31 = arith.constant dense<0.000000e+00> : vector<1x8xf32>
    %77 = vector.multi_reduction <add>, %76, %cst_31 [2] : vector<1x8x8xf32> to vector<1x8xf32>
    %78 = vector.shape_cast %77 : vector<1x8xf32> to vector<1x8x1xf32>
    %79 = vector.broadcast %78 : vector<1x8x1xf32> to vector<1x8x8xf32>
    %80 = arith.divf %76, %79 : vector<1x8x8xf32>
    %c0_32 = arith.constant 0 : index
    %c0_33 = arith.constant 0 : index
    %c2 = arith.constant 2 : index
    %c0_34 = arith.constant 0 : index
    %c0_35 = arith.constant 0 : index
    %81 = vector.load %arg9[%c0_32, %c0_33, %c2, %c0_34, %c0_35] : memref<1x1x4x8x8xf32, #tpu.memory_space<vmem>>, vector<1x1x1x8x8xf32>
    %82 = vector.shape_cast %81 : vector<1x1x1x8x8xf32> to vector<1x8x8xf32>
    %83 = vector.shape_cast %80 : vector<1x8x8xf32> to vector<1x1x1x8x8xf32>
    tpu.vector_store %arg9[%c0_32, %c0_33, %c2, %c0_34, %c0_35], %83 {strides = array<i32>} : memref<1x1x4x8x8xf32, #tpu.memory_space<vmem>>, vector<1x1x1x8x8xf32>,
    %84 = arith.truncf %80 : vector<1x8x8xf32> to vector<1x8x8xbf16>
    "tpu.trace_start"() <{level = 10 : i32, message = "bqk,bkd->bqd"}> : () -> ()
    %cst_36 = arith.constant dense<0.000000e+00> : vector<1x8x8xf32>
    %85 = tpu.matmul %84, %68, %cst_36 {dimension_numbers = #tpu.dot_dimension_numbers<[2], [1], [1], [2], [0, 0, 0, 1, 1, 2], [0], [0]>} : vector<1x8x8xbf16>, vector<1x8x8xbf16>, vector<1x8x8xf32> -> vector<1x8x8xf32>
    "tpu.trace_stop"() : () -> ()
    %86 = vector.shape_cast %85 : vector<1x8x8xf32> to vector<8x8xf32>
    %87 = arith.truncf %86 : vector<8x8xf32> to vector<8x8xbf16>
    %c0_37 = arith.constant 0 : index
    %c16 = arith.constant 16 : index
    %88 = vector.load %arg10[%c0_37, %c16] : memref<8x32xbf16, #tpu.memory_space<vmem>>, vector<8x8xbf16>
    tpu.vector_store %arg10[%c0_37, %c16], %87 {strides = array<i32>} : memref<8x32xbf16, #tpu.memory_space<vmem>>, vector<8x8xbf16>,
    %89 = vector.extract_strided_slice %9 {offsets = [0, 0, 24], sizes = [1, 8, 8], strides = [1, 1, 1]} : vector<1x8x96xf32> to vector<1x8x8xf32>
    %90 = arith.truncf %89 : vector<1x8x8xf32> to vector<1x8x8xbf16>
    %91 = vector.extract_strided_slice %9 {offsets = [0, 0, 56], sizes = [1, 8, 8], strides = [1, 1, 1]} : vector<1x8x96xf32> to vector<1x8x8xf32>
    %92 = arith.truncf %91 : vector<1x8x8xf32> to vector<1x8x8xbf16>
    %93 = vector.extract_strided_slice %9 {offsets = [0, 0, 88], sizes = [1, 8, 8], strides = [1, 1, 1]} : vector<1x8x96xf32> to vector<1x8x8xf32>
    %94 = arith.truncf %93 : vector<1x8x8xf32> to vector<1x8x8xbf16>
    "tpu.trace_start"() <{level = 10 : i32, message = "bqd,bkd->bqk"}> : () -> ()
    %cst_38 = arith.constant dense<0.000000e+00> : vector<1x8x8xf32>
    %95 = tpu.matmul %90, %92, %cst_38 {dimension_numbers = #tpu.dot_dimension_numbers<[2], [2], [1], [1], [0, 0, 0, 1, 1, 1], [0], [0]>} : vector<1x8x8xbf16>, vector<1x8x8xbf16>, vector<1x8x8xf32> -> vector<1x8x8xf32>
    "tpu.trace_stop"() : () -> ()
    %96 = vector.broadcast %10 : vector<1x1x8xf32> to vector<1x8x8xf32>
    %97 = arith.addf %95, %96 : vector<1x8x8xf32>
    %cst_39 = arith.constant dense<0xFF800000> : vector<1x8xf32>
    %98 = vector.multi_reduction <maximumf>, %97, %cst_39 [2] : vector<1x8x8xf32> to vector<1x8xf32>
    %99 = vector.shape_cast %98 : vector<1x8xf32> to vector<1x8x1xf32>
    %100 = vector.broadcast %99 : vector<1x8x1xf32> to vector<1x8x8xf32>
    %101 = arith.subf %97, %100 : vector<1x8x8xf32>
    %102 = math.exp %101 : vector<1x8x8xf32>
    %cst_40 = arith.constant dense<0.000000e+00> : vector<1x8xf32>
    %103 = vector.multi_reduction <add>, %102, %cst_40 [2] : vector<1x8x8xf32> to vector<1x8xf32>
    %104 = vector.shape_cast %103 : vector<1x8xf32> to vector<1x8x1xf32>
    %105 = vector.broadcast %104 : vector<1x8x1xf32> to vector<1x8x8xf32>
    %106 = arith.divf %102, %105 : vector<1x8x8xf32>
    %c0_41 = arith.constant 0 : index
    %c0_42 = arith.constant 0 : index
    %c3 = arith.constant 3 : index
    %c0_43 = arith.constant 0 : index
    %c0_44 = arith.constant 0 : index
    %107 = vector.load %arg9[%c0_41, %c0_42, %c3, %c0_43, %c0_44] : memref<1x1x4x8x8xf32, #tpu.memory_space<vmem>>, vector<1x1x1x8x8xf32>
    %108 = vector.shape_cast %107 : vector<1x1x1x8x8xf32> to vector<1x8x8xf32>
    %109 = vector.shape_cast %106 : vector<1x8x8xf32> to vector<1x1x1x8x8xf32>
    tpu.vector_store %arg9[%c0_41, %c0_42, %c3, %c0_43, %c0_44], %109 {strides = array<i32>} : memref<1x1x4x8x8xf32, #tpu.memory_space<vmem>>, vector<1x1x1x8x8xf32>,
    %110 = arith.truncf %106 : vector<1x8x8xf32> to vector<1x8x8xbf16>
    "tpu.trace_start"() <{level = 10 : i32, message = "bqk,bkd->bqd"}> : () -> ()
    %cst_45 = arith.constant dense<0.000000e+00> : vector<1x8x8xf32>
    %111 = tpu.matmul %110, %94, %cst_45 {dimension_numbers = #tpu.dot_dimension_numbers<[2], [1], [1], [2], [0, 0, 0, 1, 1, 2], [0], [0]>} : vector<1x8x8xbf16>, vector<1x8x8xbf16>, vector<1x8x8xf32> -> vector<1x8x8xf32>
    "tpu.trace_stop"() : () -> ()
    %112 = vector.shape_cast %111 : vector<1x8x8xf32> to vector<8x8xf32>
    %113 = arith.truncf %112 : vector<8x8xf32> to vector<8x8xbf16>
    %c0_46 = arith.constant 0 : index
    %c24 = arith.constant 24 : index
    %114 = vector.load %arg10[%c0_46, %c24] : memref<8x32xbf16, #tpu.memory_space<vmem>>, vector<8x8xbf16>
    tpu.vector_store %arg10[%c0_46, %c24], %113 {strides = array<i32>} : memref<8x32xbf16, #tpu.memory_space<vmem>>, vector<8x8xbf16>,
    %c0_47 = arith.constant 0 : index
    %c0_48 = arith.constant 0 : index
    %115 = vector.load %arg10[%c0_47, %c0_48] : memref<8x32xbf16, #tpu.memory_space<vmem>>, vector<8x32xbf16>
    %c0_49 = arith.constant 0 : index
    %c0_50 = arith.constant 0 : index
    %c0_51 = arith.constant 0 : index
    %116 = vector.load %arg5[%c0_49, %c0_50, %c0_51] : memref<1x32x32xbf16, #tpu.memory_space<vmem>>, vector<1x32x32xbf16>
    %117 = vector.shape_cast %116 : vector<1x32x32xbf16> to vector<32x32xbf16>
    %cst_52 = arith.constant dense<0.000000e+00> : vector<8x32xf32>
    %118 = tpu.matmul %115, %117, %cst_52 {dimension_numbers = #tpu.dot_dimension_numbers<[1], [0], [0], [1], [0, 0, 1, 1], [], []>} : vector<8x32xbf16>, vector<32x32xbf16>, vector<8x32xf32> -> vector<8x32xf32>
    %119 = vector.shape_cast %3 : vector<1x8x32xf32> to vector<8x32xf32>
    %120 = arith.addf %118, %119 : vector<8x32xf32>
    %cst_53 = arith.constant dense<0.000000e+00> : vector<8xf32>
    %121 = vector.multi_reduction <add>, %120, %cst_53 [1] : vector<8x32xf32> to vector<8xf32>
    %122 = vector.shape_cast %121 : vector<8xf32> to vector<8x1xf32>
    %cst_54 = arith.constant 3.200000e+01 : f32
    %123 = vector.broadcast %cst_54 : f32 to vector<8x1xf32>
    %124 = arith.divf %122, %123 : vector<8x1xf32>
    %125 = vector.broadcast %124 : vector<8x1xf32> to vector<8x32xf32>
    %126 = arith.subf %120, %125 : vector<8x32xf32>
    %127 = vector.broadcast %124 : vector<8x1xf32> to vector<8x32xf32>
    %128 = arith.subf %120, %127 : vector<8x32xf32>
    %129 = arith.mulf %126, %128 : vector<8x32xf32>
    %cst_55 = arith.constant dense<0.000000e+00> : vector<8xf32>
    %130 = vector.multi_reduction <add>, %129, %cst_55 [1] : vector<8x32xf32> to vector<8xf32>
    %131 = vector.shape_cast %130 : vector<8xf32> to vector<8x1xf32>
    %cst_56 = arith.constant 3.200000e+01 : f32
    %132 = vector.broadcast %cst_56 : f32 to vector<8x1xf32>
    %133 = arith.divf %131, %132 : vector<8x1xf32>
    %134 = vector.broadcast %124 : vector<8x1xf32> to vector<8x32xf32>
    %135 = arith.subf %120, %134 : vector<8x32xf32>
    %cst_57 = arith.constant 9.99999974E-6 : f32
    %136 = vector.broadcast %cst_57 : f32 to vector<8x1xf32>
    %137 = arith.addf %133, %136 : vector<8x1xf32>
    %138 = math.rsqrt %137 : vector<8x1xf32>
    %139 = vector.broadcast %138 : vector<8x1xf32> to vector<8x32xf32>
    %140 = arith.mulf %135, %139 : vector<8x32xf32>
    %141 = arith.truncf %140 : vector<8x32xf32> to vector<8x32xbf16>
    %c0_58 = arith.constant 0 : index
    %c0_59 = arith.constant 0 : index
    %c0_60 = arith.constant 0 : index
    %142 = vector.load %arg6[%c0_58, %c0_59, %c0_60] : memref<1x32x64xbf16, #tpu.memory_space<vmem>>, vector<1x32x64xbf16>
    %143 = vector.shape_cast %142 : vector<1x32x64xbf16> to vector<32x64xbf16>
    %cst_61 = arith.constant dense<0.000000e+00> : vector<8x64xf32>
    %144 = tpu.matmul %141, %143, %cst_61 {dimension_numbers = #tpu.dot_dimension_numbers<[1], [0], [0], [1], [0, 0, 1, 1], [], []>} : vector<8x32xbf16>, vector<32x64xbf16>, vector<8x64xf32> -> vector<8x64xf32>
    %cst_62 = arith.constant 0.000000e+00 : f32
    %145 = vector.broadcast %cst_62 : f32 to vector<8x64xf32>
    %146 = arith.maximumf %144, %145 : vector<8x64xf32>
    %147 = arith.truncf %146 : vector<8x64xf32> to vector<8x64xbf16>
    %c0_63 = arith.constant 0 : index
    %c0_64 = arith.constant 0 : index
    %c0_65 = arith.constant 0 : index
    %148 = vector.load %arg7[%c0_63, %c0_64, %c0_65] : memref<1x64x32xbf16, #tpu.memory_space<vmem>>, vector<1x64x32xbf16>
    %149 = vector.shape_cast %148 : vector<1x64x32xbf16> to vector<64x32xbf16>
    %cst_66 = arith.constant dense<0.000000e+00> : vector<8x32xf32>
    %150 = tpu.matmul %147, %149, %cst_66 {dimension_numbers = #tpu.dot_dimension_numbers<[1], [0], [0], [1], [0, 0, 1, 1], [], []>} : vector<8x64xbf16>, vector<64x32xbf16>, vector<8x32xf32> -> vector<8x32xf32>
    %151 = arith.addf %150, %140 : vector<8x32xf32>
    %cst_67 = arith.constant dense<0.000000e+00> : vector<8xf32>
    %152 = vector.multi_reduction <add>, %151, %cst_67 [1] : vector<8x32xf32> to vector<8xf32>
    %153 = vector.shape_cast %152 : vector<8xf32> to vector<8x1xf32>
    %cst_68 = arith.constant 3.200000e+01 : f32
    %154 = vector.broadcast %cst_68 : f32 to vector<8x1xf32>
    %155 = arith.divf %153, %154 : vector<8x1xf32>
    %156 = vector.broadcast %155 : vector<8x1xf32> to vector<8x32xf32>
    %157 = arith.subf %151, %156 : vector<8x32xf32>
    %158 = vector.broadcast %155 : vector<8x1xf32> to vector<8x32xf32>
    %159 = arith.subf %151, %158 : vector<8x32xf32>
    %160 = arith.mulf %157, %159 : vector<8x32xf32>
    %cst_69 = arith.constant dense<0.000000e+00> : vector<8xf32>
    %161 = vector.multi_reduction <add>, %160, %cst_69 [1] : vector<8x32xf32> to vector<8xf32>
    %162 = vector.shape_cast %161 : vector<8xf32> to vector<8x1xf32>
    %cst_70 = arith.constant 3.200000e+01 : f32
    %163 = vector.broadcast %cst_70 : f32 to vector<8x1xf32>
    %164 = arith.divf %162, %163 : vector<8x1xf32>
    %165 = vector.broadcast %155 : vector<8x1xf32> to vector<8x32xf32>
    %166 = arith.subf %151, %165 : vector<8x32xf32>
    %cst_71 = arith.constant 9.99999974E-6 : f32
    %167 = vector.broadcast %cst_71 : f32 to vector<8x1xf32>
    %168 = arith.addf %164, %167 : vector<8x1xf32>
    %169 = math.rsqrt %168 : vector<8x1xf32>
    %170 = vector.broadcast %169 : vector<8x1xf32> to vector<8x32xf32>
    %171 = arith.mulf %166, %170 : vector<8x32xf32>
    %172 = vector.shape_cast %171 : vector<8x32xf32> to vector<1x8x32xf32>
    %c0_72 = arith.constant 0 : index
    %c0_73 = arith.constant 0 : index
    %c0_74 = arith.constant 0 : index
    %173 = vector.load %arg8[%c0_72, %c0_73, %c0_74] : memref<1x8x32xf32, #tpu.memory_space<vmem>>, vector<1x8x32xf32>
    tpu.vector_store %arg8[%c0_72, %c0_73, %c0_74], %172 {strides = array<i32>} : memref<1x8x32xf32, #tpu.memory_space<vmem>>, vector<1x8x32xf32>,
    return
  }
  func.func @transform_0(%arg0: i32, %arg1: i32) -> (i32, i32, i32) {
    %c0_i32 = arith.constant 0 : i32
    %c0_i32_0 = arith.constant 0 : i32
    %c0_i32_1 = arith.constant 0 : i32
    return %arg0, %c0_i32, %c0_i32_0 : i32, i32, i32
  }
  func.func @transform_1(%arg0: i32, %arg1: i32) -> (i32, i32, i32) {
    %c0_i32 = arith.constant 0 : i32
    %c0_i32_0 = arith.constant 0 : i32
    %c0_i32_1 = arith.constant 0 : i32
    return %arg0, %c0_i32, %c0_i32_0 : i32, i32, i32
  }
  func.func @transform_2(%arg0: i32, %arg1: i32) -> (i32, i32, i32) {
    %c0_i32 = arith.constant 0 : i32
    %c0_i32_0 = arith.constant 0 : i32
    %c0_i32_1 = arith.constant 0 : i32
    return %arg1, %c0_i32, %c0_i32_0 : i32, i32, i32
  }
  func.func @transform_3(%arg0: i32, %arg1: i32) -> (i32, i32, i32) {
    %c0_i32 = arith.constant 0 : i32
    %c0_i32_0 = arith.constant 0 : i32
    %c0_i32_1 = arith.constant 0 : i32
    return %arg1, %c0_i32, %c0_i32_0 : i32, i32, i32
  }
  func.func @transform_4(%arg0: i32, %arg1: i32) -> (i32, i32, i32) {
    %c0_i32 = arith.constant 0 : i32
    %c0_i32_0 = arith.constant 0 : i32
    %c0_i32_1 = arith.constant 0 : i32
    return %arg1, %c0_i32, %c0_i32_0 : i32, i32, i32
  }
  func.func @transform_5(%arg0: i32, %arg1: i32) -> (i32, i32, i32) {
    %c0_i32 = arith.constant 0 : i32
    %c0_i32_0 = arith.constant 0 : i32
    %c0_i32_1 = arith.constant 0 : i32
    return %arg1, %c0_i32, %c0_i32_0 : i32, i32, i32
  }
  func.func @transform_6(%arg0: i32, %arg1: i32) -> (i32, i32, i32) {
    %c0_i32 = arith.constant 0 : i32
    %c0_i32_0 = arith.constant 0 : i32
    %c0_i32_1 = arith.constant 0 : i32
    return %arg0, %c0_i32, %c0_i32_0 : i32, i32, i32
  }
  func.func @transform_7(%arg0: i32, %arg1: i32) -> (i32, i32, i32, i32, i32) {
    %c0_i32 = arith.constant 0 : i32
    %c0_i32_0 = arith.constant 0 : i32
    %c0_i32_1 = arith.constant 0 : i32
    %c0_i32_2 = arith.constant 0 : i32
    return %arg1, %arg0, %c0_i32, %c0_i32_0, %c0_i32_1 : i32, i32, i32, i32, i32
  }
}

</mosaic_0001>

<bundles_post_ra>
// kernel: tpu_custom_call.1
= control target key start
LH: loop header
LB: loop body
LE: loop exit
PB: predicated region body
PF: predicated region fallthrough
CT: control target
= control target key end

     0   :  { %s2057_s0 = inlined_call_operand.hbm [shape: f32[2,8,32], index: 0, kind: input, shape index: {}]   ;;  %s2058_s1 = inlined_call_operand.hbm [shape: f32[2,1,8], index: 1, kind: input, shape index: {}]   ;;  %s2059_s2 = inlined_call_operand.vmem [shape: bf16[2,32,96], index: 2, kind: input, shape index: {}]   ;;  %s2060_s3 = inlined_call_operand.vmem [shape: bf16[2,32,32], index: 3, kind: input, shape index: {}]   ;;  %s2061_s4 = inlined_call_operand.vmem [shape: bf16[2,32,64], index: 4, kind: input, shape index: {}]   ;;  %s2062_s5 = inlined_call_operand.vmem [shape: bf16[2,64,32], index: 5, kind: input, shape index: {}]   ;;  %s2063_s6 = inlined_call_operand.hbm [shape: f32[2,8,32], index: 6, kind: output, shape index: {0}]   ;;  %s2064_s7 = inlined_call_operand.hbm [shape: f32[2,2,4,8,8], index: 7, kind: output, shape index: {1}]  }
   0x1   :  { %2079 = sst [smem:[#allocation28_spill]] %s2057_s0 }
   0x2   :  { %2080 = sst [smem:[#allocation29_spill]] %s2058_s1 }
   0x3   :  { %2081 = sst [smem:[#allocation30_spill]] %s2063_s6 }
   0x4   :  { %13 = vsyncpa [#allocation4], 0 }
   0x5   :  { %15 = vsyncpa [#allocation4 + $0x1], 0 }
   0x6   :  { %16 = vsyncpa [#allocation7], 0 }
   0x7   :  { %18 = vsyncpa [#allocation7 + $0x1], 0 }
   0x8   :  { %19 = vsyncpa [#allocation5], 0 }
   0x9   :  { %21 = vsyncpa [#allocation5 + $0x1], 0 }
   0xa   :  { %22 = vsyncpa [#allocation10], 0 }
   0xb   :  { %24 = vsyncpa [#allocation10 + $0x1], 0  ;;  %s1710_s24 = smov 0   ;;  %s1712_s25 = smov 0  }
   0xc   :  { %s1714_s26 = smov 0   ;;  %s1716_s27 = smov 0  }
   0xd   :  { %s1718_s28 = smov 0   ;;  %s1720_s29 = smov 0  }
   0xe   :  { %s1722_s30 = smov 0   ;;  %s1724_s8 = smov 0  }
   0xf   :  { %s1726_s9 = smov 0   ;;  %s1728_s10 = smov 0  }
  0x10   :  { %s1730_s11 = smov 0  }
  0x11 LB: > { %2082 = sst [smem:[#allocation15_spill]] %s1612_s24  ;;  %s1187_s12 = sadd.s32 4294967295, %s1652_s11   ;;  %s1652_s11 = sphi %s1730_s11, %s30_s11   ;;  %s1648_s10 = sphi %s1728_s10, %s2120_s10   ;;  %s1644_s9 = sphi %s1726_s9, %s2119_s9   ;;  %s1640_s8 = sphi %s1724_s8, %s2118_s8   ;;  %s1636_s30 = sphi %s1722_s30, %s2117_s30   ;;  %s1632_s29 = sphi %s1720_s29, %s2116_s29   ;;  %s1628_s28 = sphi %s1718_s28, %s2124_s28   ;;  %s1624_s27 = sphi %s1716_s27, %s2123_s27   ;;  %s1620_s26 = sphi %s1714_s26, %s2114_s26   ;;  %s1616_s25 = sphi %s1712_s25, %s2122_s25   ;;  %s1612_s24 = sphi %s1710_s24, %s2121_s24  }
  0x12   : > { %2083 = sst [smem:[#allocation16_spill]] %s1620_s26  ;;  %s1188_s13 = sadd.s32 4294967294, %s1652_s11  }
  0x13   : > { %2084 = sst [smem:[#allocation17_spill]] %s1624_s27  ;;  %s39_s14 = sadd.s32 1, %s1644_s9 }
  0x14   : > { %2085 = sst [smem:[#allocation18_spill]] %s1632_s29  ;;  %s42_s15 = sadd.s32 1, %s1648_s10 }
  0x15   : > { %2086 = sst [smem:[#allocation19_spill]] %s1644_s9  ;;  %p40_p0 = scmp.ge.s32.totalorder %s39_s14, 2 }
  0x16   : > { %2087 = sst [smem:[#allocation20_spill]] %s1648_s10  ;;  %s49_s16 = sadd.s32 1, %s1632_s29 }
  0x17   : > { %p56_p1 = scmp.ne.s32.totalorder %s1632_s29, %s1628_s28  ;;  %p57_p2 = scmp.eq.s32.totalorder %s1652_s11, 0 }
  0x18   : > { %s2126_s14 = smov (%p40_p0, %s39_s14), 0  ;;  %s2128_s15 = smov (!%p40_p0, %s42_s15), %s1648_s10 }
  0x19   : > { %2088 = sst [smem:[#allocation21_spill]] %s2126_s14  ;;  %p1776_p3 = por %p57_p2, %p56_p1 }
  0x1a   : > { %p62_p4 = scmp.ne.s32.totalorder %s1628_s28, %s1624_s27  ;;  %p44_p5 = scmp.ge.s32.totalorder %s2128_s15, 2 }
  0x1b   : > { %p63_p6 = scmp.eq.s32.totalorder %s1187_s12, 0  ;;  %p1782_p7 = scmp.eq.s32.totalorder %s1187_s12, 3 }
  0x1c   : > { %p1786_p8 = scmp.eq.s32.totalorder %s1188_s13, 3  ;;  %s2130_s15 = smov (%p44_p5, %s2128_s15), 0 }
  0x1d   : > { %2092 = sst [smem:[#allocation22_spill]] %s2130_s15  ;;  %p1792_p9 = por %p63_p6, %p62_p4 }
  0x1e   : > { %p1798_p10 = por %p1782_p7, %p56_p1  ;;  %s46_s22 = ssub.s32 %s1648_s10, %s2130_s15 }
  0x1f   : > { %p1806_p11 = por %p1786_p8, %p62_p4  ;;  %p47_p12 = scmp.eq.s32.totalorder %s46_s22, 0 }
  0x20   : > { %s2094_s21 = scalar_select %p1798_p10, 1, 0 }
  0x21   : > { %s2096_s23 = scalar_select %p1806_p11, 1, 0 }
  0x22   : > { %2095 = sst [smem:[#allocation23_spill]] %s2094_s21  ;;  %s228_s12 = ssub.s32 %s1644_s9, %s2126_s14 }
  0x23   : > { %2097 = sst [smem:[#allocation24_spill]] %s2096_s23  ;;  %s230_s13 = sor.u32 %s228_s12, %s46_s22 }
  0x24   : > { %s233_s27 = sadd.s32 1, %s1620_s26  ;;  %p231_p13 = scmp.eq.s32.totalorder %s230_s13, 0 }
  0x25   : > { %s1814_s6 = scalar_select %p47_p12, %s1632_s29, %s49_s16  }
  0x26   : > { %p243_p0 = scmp.ne.s32.totalorder %s1620_s26, %s1616_s25  ;;  %p249_p1 = scmp.ne.s32.totalorder %s1616_s25, %s1612_s24 }
  0x27   : > { %2098 = sst [smem:[#allocation25_spill]] %s1814_s6  ;;  %p1305_p5 = scmp.lt.s32.totalorder %s1652_s11, 4 }
  0x28   : > { %s1821_s21 = scalar_select %p231_p13, %s1620_s26, %s233_s27  }
  0x29   : > { %p1825_p2 = por %p243_p0, %p1782_p7  ;;  %p1831_p4 = por %p249_p1, %p1786_p8 }
  0x2a   : > { %2099 = sst [smem:[#allocation26_spill]] %s1821_s21  ;;  %s270_s16 = sand.u32 1, %s1632_s29  }
  0x2b   : > { %s2101_s14 = scalar_select %p1831_p4, 1, 0 }
  0x2c   : > { %s1191_s22 = sshll.u32 %s270_s16, 3  ;;  %s1192_s12 = sshll.u32 %s1648_s10, 3 }
  0x2d   : > { %2102 = sst [smem:[#allocation27_spill]] %s2101_s14  ;;  %s274_s6 = scalar_lea.vmem [#allocation3], %s1191_s22 }
  0x2e   : > { %s2103_s0 = sld [smem:[#allocation28_spill]]  ;;  %s282_s18 = sshll.u32 %s274_s6, 4  ;;  %s283_s18 = int_to_ptr.vmem [resolvable:$true] %s282_s18 }
  0x2f   : > { %p1292_p6 = pnand %p1305_p5, %p1776_p3  ;;  %p1193_p7 = scmp.ge.s32.totalorder %s1652_s11, 1 }
  0x30   : > { %p336_p8 = scmp.lt.s32.totalorder %s1652_s11, 5  ;;  %s271_s19 = scalar_lea.sflag [#allocation4], %s270_s16 }
  0x31   : > { %s2104_s1 = sld [smem:[#allocation29_spill]]  ;;  %s292_s24 = scalar_lea.vmem [#allocation6], %s270_s16 }
  0x32   : > { %p337_p12 = pnand %p1193_p7, %p336_p8  ;;  %s299_s23 = sshll.u32 %s292_s24, 4  ;;  %s300_s23 = int_to_ptr.vmem [resolvable:$true] %s299_s23 }
  0x33   : > { %s290_s6 = scalar_lea.sflag [#allocation7], %s270_s16  ;;  %s1850_s17 = sand.u32 (!%p337_p12), 1, %s1628_s28  }
  0x34   : > { %s278_s27 = scalar_lea.hbm %s2103_s0, %s1192_s12  ;;  %s343_s22 = scalar_lea.sflag (!%p337_p12), [#allocation4], %s1850_s17 }
  0x35   : > { %s280_s21 = sshll.u32 %s278_s27, 4  ;;  %340 = sbr.rel (%p337_p12) target bundleno = 1949 (0x79d), region = 44  ;;  %s281_s21 = int_to_ptr.hbm [resolvable:$true] %s280_s21 }
  0x36   : > { %1294 = dma.hbm_to_vmem [thread:$0]  (!%p1292_p6), %s281_s21, 128, %s283_s18, %s271_s19  }
  0x37   : > { %s295_s14 = scalar_lea.hbm %s2104_s1, %s1648_s10  ;;  %s1194_s21 = sshll.u32 (!%p337_p12), %s1850_s17, 3 }
  0x38   : > { %s297_s9 = sshll.u32 %s295_s14, 4  ;;  %s346_s12 = scalar_lea.vmem (!%p337_p12), [#allocation3], %s1194_s21  ;;  %s298_s9 = int_to_ptr.hbm [resolvable:$true] %s297_s9 }
  0x39   : > { %1297 = dma.hbm_to_vmem [thread:$0]  (!%p1292_p6), %s298_s9, 16, %s300_s23, %s290_s6  }
  0x3a   : > { %1595 = dma.done.wait (%p1792_p9), %s343_s22, 128  }
  0x3b   : > { %1597 = vsyncadd (%p1792_p9), %s343_s22, 4294967168  ;;  %s353_s24 = scalar_lea.sflag [#allocation7], %s1850_s17 }
  0x3c   : > { %1599 = dma.done.wait (%p1792_p9), %s353_s24, 16  }
  0x3d   : > { %1601 = vsyncadd (%p1792_p9), %s353_s24, 4294967280  ;;  %s2077_s29 = sand.u32 1, %s1616_s25   ;;  %p416_p3 = scmp.lt.s32.totalorder %s1636_s30, 1 }
  0x3e   : > { %s1196_s14 = sshll.u32 %s2077_s29, 5  ;;  %p1205_p9 = scmp.ne.s32.totalorder %s1636_s30, 0 }
  0x3f   : > { %s417_s23 = scalar_select %p416_p3, %s1636_s30, 1 }
  0x40   : > { %s1889_s10 = scalar_lea.vmem [#allocation9], %s1196_s14  ;;  %440 = sbr.rel (%p1205_p9) target bundleno = 71 (0x47), region = 56 }
  0x41   : > { %s1269_s16 = sshll.u32 %s417_s23, 4  ;;  %s1272_s13 = sshll.u32 %s417_s23, 5 }
  0x42   : > { %s420_s19 = scalar_lea.vmem %s2059_s2, %s1269_s16  ;;  %s1875_s20 = scalar_lea.vmem %s2060_s3, %s1269_s16 }
  0x43   : > { %s1880_s26 = scalar_lea.vmem %s2061_s4, %s1269_s16  ;;  %s1885_s1 = scalar_lea.vmem %s2062_s5, %s1272_s13 }
  0x44   : > { %s1887_s23 = scalar_lea.vmem [#allocation8], %s1194_s21 }
  0x45   : > { %v441_v0 = vld [vmem:[%s346_s12] sm:$0xff]  ;;  %vm442_vm0 = vcmask 261120  }
  0x46   : > { %443 = vst.msk [vmem:[%s1887_s23] sm:$0xff] %vm442_vm0, %v441_v0 }
  0x47 PF: > { %v1274_v1 = vld [vmem:[%s420_s19 + $0x8] sm:$0xff]  ;;  %v1273_v2 = vld [vmem:[%s420_s19] sm:$0xff]  ;;  %vm462_vm1 = vcmask 261120   ;;  %s1654_s0 = smov 104   ;;  %s1655_s21 = smov 120   ;;  %vm489_vm2 = vcmask 64512  }
  0x48   : > { %472 = vmatpush.bf16.msra.mxu0 %v1274_v1  ;;  %s1656_s12 = smov 96   ;;  %s1657_s29 = smov 80   ;;  %vm540_vm3 = vcmask 1043456  }
  0x49   : > { %s1658_s14 = smov 72   ;;  %s1659_s16 = smov 88  }
  0x4a   : > { %s1660_s13 = smov 112   ;;  %s2105_s27 = scalar_lea.vmem [#allocation6], %s1850_s17 }
  0x4b   : > { %v1411_v21 = vld [vmem:[%s2105_s27] ss:$0 sm:$0xff]  ;;  %s1661_s18 = smov 64   ;;  %s1662_s19 = smov 48  }
  0x4c   : > { %473 = vmatpush.bf16.msra.mxu0 %v1273_v2  ;;  %s1663_s9 = smov 56   ;;  %s1664_s6 = smov 40  }
  0x4d   : > { %v1894_v3 = vld [vmem:[%s1887_s23] sm:$0xff]  ;;  %s1665_s22 = smov 16   ;;  %s1666_s24 = smov 8  }
  0x4e   : > { %v445_v4 = vpack.c.bf16 %v1894_v3, %v1894_v3  ;;  %s2106_s27 = sand.u32 1, %s1616_s25  }
  0x50   : > { %1214 = vmatmul.msk.bf16.vlgmr.msra.gmra.mxu0 %vm462_vm1, %v445_v4 }
  0xcd   : > { %v475_v5 = vpop.f32.mrf.mxu0 }
  0xce   : > { %v480_v6 = vpack.c.bf16 %v475_v5, %v475_v5 }
  0xd0   : > { %v485_v7 = vunpack.c.l.b16 %v480_v6 }
  0xd2   : > { %v1899_v8 = vpack.c.b16 %v485_v7, %v485_v7 }
  0xd4   : > { %716 = vrot.lane.b32.xlu2 %v1899_v8, %s1654_s0  ;;  %560 = vrot.lane.b32.xlu1 %v1899_v8, %s1655_s21  ;;  %s1667_s0 = smov 24  }
  0xd5   : > { %487 = vrot.lane.b32.xlu0 %v1899_v8, %s1656_s12  ;;  %v477_v9 = vpop.f32.mrf.mxu0 }
  0xdc   : > { %640 = vrot.lane.b32.xlu2 %v1899_v8, %s1657_s29  ;;  %718 = vrot.lane.b32.xlu1 %v1899_v8, %s1658_s14 }
  0xdd   : > { %562 = vrot.lane.b32.xlu0 %v1899_v8, %s1659_s16  ;;  %s997_s16 = sshll.u32 %s1889_s10, 4  ;;  %s998_s16 = int_to_ptr.vmem [resolvable:$true] %s997_s16 }
  0xe5   : > { %638 = vrot.lane.b32.xlu0 %v1899_v8, %s1660_s13 }
 0x12e   : > { %v717_v10 = vpop.permute.xlu2 %716 }
 0x136   : > { %v641_v11 = vpop.permute.xlu2 %640 }
 0x137   : > { %v646_v12 = vsel %vm489_vm2, %v641_v11, 0 }
 0x138   : > { %655 = vmatpush.bf16.xpose.msrb.mxu0 %v646_v12 }
 0x146   : > { %v561_v13 = vpop.permute.xlu1 %560 }
 0x147   : > { %v488_v14 = vpop.permute.xlu0 %487 }
 0x148   : > { %v494_v15 = vsel %vm489_vm2, %v488_v14, 0 }
 0x149   : > { %503 = vmatpush.bf16.xpose.msra.mxu1 %v494_v15 }
 0x14e   : > { %v719_v16 = vpop.permute.xlu1 %718 }
 0x14f   : > { %v563_v17 = vpop.permute.xlu0 %562  ;;  %v724_v18 = vsel %vm489_vm2, %v719_v16, 0 }
 0x150   : > { %1215 = vmatmul.msk.bf16.vlgmr.msra.gmra.mxu1 %vm489_vm2, %v480_v6  ;;  %v568_v19 = vsel %vm489_vm2, %v563_v17, 0 }
 0x151   : > { %577 = vmatpush.bf16.xpose.msra.mxu3 %v568_v19 }
 0x157   : > { %v639_v20 = vpop.permute.xlu0 %638 }
 0x158   : > { %1217 = vmatmul.msk.bf16.vlgmr.msra.gmra.mxu3 %vm489_vm2, %v561_v13  ;;  %1220 = vmatmul.msk.bf16.vlgmr.msrb.gmra.mxu0 %vm489_vm2, %v639_v20 }
 0x159   : > { %733 = vmatpush.bf16.xpose.msrb.mxu3 %v724_v18 }
 0x168   : > { %1223 = vmatmul.msk.bf16.vlgmr.msrb.gmra.mxu3 %vm489_vm2, %v717_v10 }
 0x1cd   : > { %v505_v22 = vpop.f32.mrf.mxu1 }
 0x1ce   : > { %v506_v23 = vadd.f32 %v1411_v21, %v505_v22 }
 0x1d0   : > { %v509_v24 = vsel %vm489_vm2, %v506_v23, -inf }
 0x1d1   : > { %510 = vmax.xlane.f32.xlu1 %v509_v24 }
 0x1d5   : > { %v507_v25 = vpop.f32.mrf.mxu1  ;;  %v657_v26 = vpop.f32.mrf.mxu0 }
 0x1d6   : > { %v658_v31 = vadd.f32 %v1411_v21, %v657_v26 }
 0x1d8   : > { %v661_v33 = vsel %vm489_vm2, %v658_v31, -inf }
 0x1db   : > { %v579_v27 = vpop.f32.mrf.mxu3 }
 0x1dc   : > { %v580_v28 = vadd.f32 %v1411_v21, %v579_v27 }
 0x1dd   : > { %v659_v29 = vpop.f32.mrf.mxu0 }
 0x1de   : > { %v583_v30 = vsel %vm489_vm2, %v580_v28, -inf }
 0x1df   : > { %584 = vmax.xlane.f32.xlu2 %v583_v30 }
 0x1e3   : > { %v581_v32 = vpop.f32.mrf.mxu3 }
 0x1e7   : > { %662 = vmax.xlane.f32.xlu2 %v661_v33 }
 0x1eb   : > { %v735_v34 = vpop.f32.mrf.mxu3 }
 0x1ec   : > { %v736_v35 = vadd.f32 %v1411_v21, %v735_v34 }
 0x1ee   : > { %v739_v36 = vsel %vm489_vm2, %v736_v35, -inf }
 0x1ef   : > { %740 = vmax.xlane.f32.xlu0 %v739_v36 }
 0x1f3   : > { %v737_v37 = vpop.f32.mrf.mxu3 }
 0x203   : > { %535 = vrot.lane.b32.xlu0 %v1899_v8, %s1661_s18  ;;  %s969_s18 = scalar_lea.sflag [#allocation10], %s2106_s27 }
 0x20b   : > { %688 = vrot.lane.b32.xlu0 %v1899_v8, %s1662_s19 }
 0x244   : > { %v511_v38 = vpop.xlane.xlu1 %510 }
 0x245   : > { %v512_v39 = vsub.f32 %v506_v23, %v511_v38 }
 0x247   : > { %v513_v40 = vmul.f32 1.442695, %v512_v39 }
 0x249   : > { %1412 = vpow2.f32 %v513_v40 }
 0x24f   : > { %v1413_v41 = vpop.eup %1412 }
 0x250   : > { %v515_v42 = vsel %vm489_vm2, %v1413_v41, 0.0 }
 0x251   : > { %516 = vadd.xlane.f32.xlu1 %v515_v42 }
 0x252   : > { %v585_v43 = vpop.xlane.xlu2 %584 }
 0x253   : > { %v586_v44 = vsub.f32 %v580_v28, %v585_v43 }
 0x255   : > { %v587_v45 = vmul.f32 1.442695, %v586_v44 }
 0x257   : > { %1414 = vpow2.f32 %v587_v45 }
 0x25a   : > { %v663_v46 = vpop.xlane.xlu2 %662 }
 0x25b   : > { %v664_v47 = vsub.f32 %v658_v31, %v663_v46 }
 0x25d   : > { %v1925_v48 = vpop.eup %1414  ;;  %v665_v49 = vmul.f32 1.442695, %v664_v47 }
 0x25e   : > { %v589_v50 = vsel %vm489_vm2, %v1925_v48, 0.0 }
 0x25f   : > { %1416 = vpow2.f32 %v665_v49  ;;  %590 = vadd.xlane.f32.xlu2 %v589_v50 }
 0x262   : > { %v741_v51 = vpop.xlane.xlu0 %740 }
 0x263   : > { %v742_v52 = vsub.f32 %v736_v35, %v741_v51 }
 0x265   : > { %v1929_v53 = vpop.eup %1416  ;;  %v743_v54 = vmul.f32 1.442695, %v742_v52 }
 0x266   : > { %v667_v55 = vsel %vm489_vm2, %v1929_v53, 0.0 }
 0x267   : > { %1418 = vpow2.f32 %v743_v54  ;;  %668 = vadd.xlane.f32.xlu1 %v667_v55 }
 0x26d   : > { %v1933_v56 = vpop.eup %1418 }
 0x26e   : > { %v745_v57 = vsel %vm489_vm2, %v1933_v56, 0.0 }
 0x26f   : > { %746 = vadd.xlane.f32.xlu1 %v745_v57 }
 0x275   : > { %v536_v58 = vpop.permute.xlu0 %535 }
 0x276   : > { %v542_v59 = vsel %vm540_vm3, %v536_v58, 0 }
 0x277   : > { %551 = vmatpush.bf16.msra.mxu2 %v542_v59  ;;  %610 = vrot.lane.b32.xlu2 %v1899_v8, %s1663_s9 }
 0x27d   : > { %v689_v60 = vpop.permute.xlu0 %688 }
 0x27e   : > { %v694_v61 = vsel %vm540_vm3, %v689_v60, 0 }
 0x27f   : > { %703 = vmatpush.bf16.msrb.mxu1 %v694_v61 }
 0x288   : > { %766 = vrot.lane.b32.xlu1 %v1899_v8, %s1664_s6 }
 0x2c4   : > { %v517_v62 = vpop.xlane.xlu1 %516 }
 0x2c5   : > { %1420 = vrcp.f32 %v517_v62  ;;  %v529_v2 = vand.u32 2147483648, %v517_v62  ;;  %v527_v5 = vand.u32 2147483647, %v517_v62  ;;  %vm523_vm5 = vweird.f32 %v517_v62 }
 0x2c7   : > { %v530_v9 = vor.u32 1.1754944e-38, %v529_v2  ;;  %vm528_vm7 = vcmp.eq.f32.partialorder %v527_v5, 8.507059e+37  ;;  %v1275_v5 = vld [vmem:[%s1875_s20] sm:$0xff] }
 0x2cb   : > { %v1421_v63 = vpop.eup %1420 }
 0x2cc   : > { %v519_v0 = vmul.f32 %v1421_v63, %v517_v62  ;;  %vm524_vm4 = vweird.f32 %v1421_v63 }
 0x2cd   : > { %vm525_vm6 = vmor %vm523_vm5, %vm524_vm4 }
 0x2ce   : > { %v520_v1 = vsub.f32 1.0, %v519_v0 }
 0x2d0   : > { %v521_v4 = vmul.f32 %v1421_v63, %v520_v1 }
 0x2d2   : > { %v522_v6 = vadd.f32 %v1421_v63, %v521_v4  ;;  %v591_v7 = vpop.xlane.xlu2 %590  ;;  %v1276_v4 = vld [vmem:[%s1875_s20 + $0x8] sm:$0xff] }
 0x2d3   : > { %1422 = vrcp.f32 %v591_v7  ;;  %v603_v20 = vand.u32 2147483648, %v591_v7  ;;  %v601_v21 = vand.u32 2147483647, %v591_v7  ;;  %vm597_vm9 = vweird.f32 %v591_v7  ;;  %820 = vmatpush.bf16.msra.mxu0 %v1276_v4 }
 0x2d4   : > { %v526_v10 = vsel %vm525_vm6, %v1421_v63, %v522_v6 }
 0x2d5   : > { %v531_v11 = vsel %vm528_vm7, %v530_v9, %v526_v10  ;;  %v604_v25 = vor.u32 1.1754944e-38, %v603_v20  ;;  %vm602_vm11 = vcmp.eq.f32.partialorder %v601_v21, 8.507059e+37  ;;  %vm558_vm7 = vcmask 60416  }
 0x2d6   : > { %v532_v8 = vmul.f32 %v1413_v41, %v531_v11 }
 0x2d7   : > { %821 = vmatpush.bf16.msra.mxu0 %v1275_v5 }
 0x2d8   : > { %533 = vst.msk [vmem:[%s1889_s10] sm:$0xff] %vm489_vm2, %v532_v8  ;;  %v534_v12 = vpack.c.bf16 %v532_v8, %v532_v8 }
 0x2d9   : > { %v1423_v13 = vpop.eup %1422 }
 0x2da   : > { %v593_v14 = vmul.f32 %v1423_v13, %v591_v7  ;;  %1216 = vmatmul.msk.bf16.vlgmr.msra.gmra.mxu2 %vm489_vm2, %v534_v12  ;;  %v669_v15 = vpop.xlane.xlu1 %668  ;;  %v611_v16 = vpop.permute.xlu2 %610  ;;  %vm598_vm8 = vweird.f32 %v1423_v13 }
 0x2db   : > { %1424 = vrcp.f32 %v669_v15  ;;  %v616_v18 = vsel %vm540_vm3, %v611_v16, 0  ;;  %vm599_vm10 = vmor %vm597_vm9, %vm598_vm8  ;;  %v681_v30 = vand.u32 2147483648, %v669_v15  ;;  %v679_v33 = vand.u32 2147483647, %v669_v15 }
 0x2dc   : > { %v594_v17 = vsub.f32 1.0, %v593_v14  ;;  %625 = vmatpush.bf16.msrb.mxu2 %v616_v18  ;;  %vm675_vm13 = vweird.f32 %v669_v15  ;;  %vm792_vm8 = vcmask 257216   ;;  %v1668_v14 = vmov 32.0  }
 0x2dd   : > { %v682_v37 = vor.u32 1.1754944e-38, %v681_v30  ;;  %vm680_vm15 = vcmp.eq.f32.partialorder %v679_v33, 8.507059e+37 }
 0x2de   : > { %v595_v19 = vmul.f32 %v1423_v13, %v594_v17 }
 0x2e0   : > { %v596_v22 = vadd.f32 %v1423_v13, %v595_v19 }
 0x2e1   : > { %v1425_v23 = vpop.eup %1424 }
 0x2e2   : > { %v600_v24 = vsel %vm599_vm10, %v1423_v13, %v596_v22  ;;  %v671_v26 = vmul.f32 %v1425_v23, %v669_v15  ;;  %v747_v27 = vpop.xlane.xlu1 %746  ;;  %vm676_vm12 = vweird.f32 %v1425_v23 }
 0x2e3   : > { %1426 = vrcp.f32 %v747_v27  ;;  %v605_v29 = vsel %vm602_vm11, %v604_v25, %v600_v24  ;;  %vm677_vm14 = vmor %vm675_vm13, %vm676_vm12  ;;  %v759_v43 = vand.u32 2147483648, %v747_v27  ;;  %v757_v45 = vand.u32 2147483647, %v747_v27  ;;  %v1278_v25 = vld [vmem:[%s1880_s26 + $0x8] sm:$0xff] }
 0x2e4   : > { %v672_v28 = vsub.f32 1.0, %v671_v26  ;;  %v606_v31 = vmul.f32 %v1925_v48, %v605_v29  ;;  %vm753_vm4 = vweird.f32 %v747_v27  ;;  %1428 = vrcp.f32 %v1668_v14  ;;  %882 = vmatpush.bf16.msra.mxu1 %v1278_v25  ;;  %v1277_v26 = vld [vmem:[%s1880_s26] sm:$0xff]  ;;  %s1265_s26 = sshll.u32 %s1636_s30, 3 }
 0x2e5   : > { %v760_v48 = vor.u32 1.1754944e-38, %v759_v43  ;;  %vm758_vm6 = vcmp.eq.f32.partialorder %v757_v45, 8.507059e+37  ;;  %vm923_vm13 = vcmask 523264  }
 0x2e6   : > { %v673_v32 = vmul.f32 %v1425_v23, %v672_v28  ;;  %1218 = vst.msk [vmem:[%s1889_s10 + $0x8] sm:$0xff] %vm489_vm2, %v606_v31  ;;  %v609_v35 = vpack.c.bf16 %v606_v31, %v606_v31  ;;  %v1281_v28 = vld [vmem:[%s1885_s1 + $0x10] sm:$0xff]  ;;  %v1280_v31 = vld [vmem:[%s1885_s1 + $0x8] sm:$0xff] }
 0x2e8   : > { %v674_v34 = vadd.f32 %v1425_v23, %v673_v32  ;;  %883 = vmatpush.bf16.msra.mxu1 %v1277_v26 }
 0x2e9   : > { %v1427_v36 = vpop.eup %1426 }
 0x2ea   : > { %v678_v38 = vsel %vm677_vm14, %v1425_v23, %v674_v34  ;;  %v749_v39 = vmul.f32 %v1427_v36, %v747_v27  ;;  %1219 = vmatmul.msk.bf16.vlgmr.msrb.gmra.mxu2 %vm489_vm2, %v609_v35  ;;  %vm754_vm0 = vweird.f32 %v1427_v36  ;;  %v1429_v15 = vpop.eup %1428  ;;  %v1282_v27 = vld [vmem:[%s1885_s1 + $0x18] sm:$0xff] }
 0x2eb   : > { %v683_v40 = vsel %vm680_vm15, %v682_v37, %v678_v38  ;;  %vm755_vm5 = vmor %vm753_vm4, %vm754_vm0  ;;  %v831_v16 = vmul.f32 32.0, %v1429_v15  ;;  %vm835_vm9 = vweird.f32 %v1429_v15  ;;  %931 = vmatpush.bf16.msra.mxu3 %v1282_v27 }
 0x2ec   : > { %v750_v41 = vsub.f32 1.0, %v749_v39  ;;  %v684_v42 = vmul.f32 %v1929_v53, %v683_v40 }
 0x2ed   : > { %v832_v17 = vsub.f32 1.0, %v831_v16 }
 0x2ee   : > { %v751_v44 = vmul.f32 %v1427_v36, %v750_v41  ;;  %1221 = vst.msk [vmem:[%s1889_s10 + $0x10] sm:$0xff] %vm489_vm2, %v684_v42  ;;  %v687_v46 = vpack.c.bf16 %v684_v42, %v684_v42  ;;  %v1279_v42 = vld [vmem:[%s1885_s1] sm:$0xff]  ;;  %s1264_s1 = sshll.u32 %s1640_s8, 2 }
 0x2ef   : > { %v833_v18 = vmul.f32 %v1429_v15, %v832_v17  ;;  %932 = vmatpush.bf16.msra.mxu3 %v1281_v28  ;;  %s994_s20 = sadd.s32 %s1265_s26, %s1264_s1 }
 0x2f0   : > { %v752_v47 = vadd.f32 %v1427_v36, %v751_v44  ;;  %1222 = vmatmul.msk.bf16.vlgmr.msrb.gmra.mxu1 %vm489_vm2, %v687_v46  ;;  %s1266_s21 = sshll.u32 %s994_s20, 3 }
 0x2f1   : > { %v834_v19 = vadd.f32 %v1429_v15, %v833_v18  ;;  %s996_s14 = scalar_lea.hbm %s2064_s7, %s1266_s21 }
 0x2f2   : > { %v756_v49 = vsel %vm755_vm5, %v1427_v36, %v752_v47  ;;  %s999_s13 = sshll.u32 %s996_s14, 4  ;;  %s1000_s13 = int_to_ptr.hbm [resolvable:$true] %s999_s13 }
 0x2f3   : > { %v761_v50 = vsel %vm758_vm6, %v760_v48, %v756_v49  ;;  %v1964_v20 = vsel %vm835_vm9, %v1429_v15, %v834_v19  ;;  %933 = vmatpush.bf16.msra.mxu3 %v1280_v31  ;;  %s1508_s19 = sshra.s32 %s1000_s13, 4  ;;  %s1509_s19 = int_to_ptr.hbm [resolvable:$true] %s1508_s19 }
 0x2f4   : > { %v762_v51 = vmul.f32 %v1933_v56, %v761_v50  ;;  %s1510_s9 = scalar_lea.hbm %s1509_s19, 32  ;;  %p1515_p5 = scmp.lt.s32.totalorder %s1509_s19, %s2064_s7 }
 0x2f5   : > { %p1511_p13 = scmp.ne.s32.totalorder %s1509_s19, %s1510_s9 }
 0x2f6   : > { %1224 = vst.msk [vmem:[%s1889_s10 + $0x18] sm:$0xff] %vm489_vm2, %v762_v51  ;;  %v765_v54 = vpack.c.bf16 %v762_v51, %v762_v51 }
 0x2f7   : > { %934 = vmatpush.bf16.msra.mxu3 %v1279_v42  ;;  %p1512_p0 = pnand %p1511_p13, %p1825_p2 }
 0x2f9   : > { %p1513_p1 = pneg %p1512_p0 }
 0x2fa   : > { %v767_v52 = vpop.permute.xlu1 %766 }
 0x2fb   : > { %v772_v53 = vsel %vm540_vm3, %v767_v52, 0  ;;  %vm714_vm3 = vcmask 191616  }
 0x2fc   : > { %781 = vmatpush.bf16.msra.mxu2 %v772_v53 }
 0x2ff   : > { %1225 = vmatmul.msk.bf16.vlgmr.msra.gmra.mxu2 %vm489_vm2, %v765_v54  ;;  %vm636_vm2 = vcmask 126016  }
 0x35d   : > { %v553_v55 = vpop.f32.mrf.mxu2 }
 0x35e   : > { %v557_v57 = vpack.c.bf16 %v553_v55, %v553_v55 }
 0x360   : > { %559 = vst.msk [vmem:[#allocation2] sm:$0xf] %vm558_vm7, %v557_v57 }
 0x365   : > { %v555_v58 = vpop.f32.mrf.mxu2 }
 0x36d   : > { %v627_v59 = vpop.f32.mrf.mxu2  ;;  %v705_v60 = vpop.f32.mrf.mxu1 }
 0x36e   : > { %v631_v61 = vpack.c.bf16 %v627_v59, %v627_v59  ;;  %v709_v56 = vpack.c.bf16 %v705_v60, %v705_v60 }
 0x370   : > { %711 = vrot.lane.b32.xlu2 %v709_v56, %s1665_s22  ;;  %633 = vrot.lane.b32.xlu0 %v631_v61, %s1666_s24  ;;  %s1514_s22 = scalar_lea.hbm %s2064_s7, 128 }
 0x371   : > { %p1516_p6 = scmp.lt.s32.totalorder %s1514_s22, %s1510_s9 }
 0x373   : > { %p1517_p7 = por %p1516_p6, %p1515_p5 }
 0x375   : > { %v629_v62 = vpop.f32.mrf.mxu2  ;;  %v707_v63 = vpop.f32.mrf.mxu1  ;;  %p1518_p8 = pnand %p1517_p7, %p1513_p1 }
 0x382   : > { %v783_v0 = vpop.f32.mrf.mxu2 }
 0x383   : > { %v787_v1 = vpack.c.bf16 %v783_v0, %v783_v0 }
 0x385   : > { %789 = vrot.lane.b32.xlu0 %v787_v1, %s1667_s0 }
 0x38a   : > { %v785_v2 = vpop.f32.mrf.mxu2 }
 0x3ca   : > { %v712_v7 = vpop.permute.xlu2 %711 }
 0x3e2   : > { %v634_v6 = vpop.permute.xlu0 %633 }
 0x3e3   : > { %637 = vst.msk [vmem:[#allocation2] sm:$0xf] %vm636_vm2, %v634_v6 }
 0x3e4   : > { %715 = vst.msk [vmem:[#allocation2] sm:$0xf] %vm714_vm3, %v712_v7 }
 0x3f7   : > { %v790_v9 = vpop.permute.xlu0 %789 }
 0x3f8   : > { %793 = vst.msk [vmem:[#allocation2] sm:$0xf] %vm792_vm8, %v790_v9 }
 0x3ff   : > { %v794_v10 = vld [vmem:[#allocation2] sm:$0xf] }
 0x400   : > { %1234 = vmatmul.msk.bf16.vlgmr.msra.gmra.mxu0 %vm462_vm1, %v794_v10 }
 0x47d   : > { %v823_v11 = vpop.f32.mrf.mxu0 }
 0x47e   : > { %v824_v8 = vadd.f32 %v823_v11, %v1894_v3 }
 0x480   : > { %v827_v12 = vsel %vm462_vm1, %v824_v8, 0.0 }
 0x481   : > { %828 = vadd.xlane.f32.xlu2 %v827_v12 }
 0x485   : > { %v825_v13 = vpop.f32.mrf.mxu0 }
 0x4f4   : > { %v829_v21 = vpop.xlane.xlu2 %828 }
 0x4f5   : > { %v837_v3 = vmul.f32 %v1964_v20, %v829_v21 }
 0x4f7   : > { %v838_v22 = vsub.f32 %v824_v8, %v837_v3 }
 0x4f9   : > { %v839_v23 = vmul.f32 %v838_v22, %v838_v22 }
 0x4fb   : > { %v840_v24 = vsel %vm462_vm1, %v839_v23, 0.0 }
 0x4fc   : > { %841 = vadd.xlane.f32.xlu1 %v840_v24 }
 0x56f   : > { %v842_v29 = vpop.xlane.xlu1 %841 }
 0x570   : > { %v843_v30 = vmul.f32 %v842_v29, %v1964_v20 }
 0x572   : > { %v844_v32 = vadd.f32 1e-05, %v843_v30 }
 0x574   : > { %1430 = vrsqrt.f32 %v844_v32  ;;  %vm851_vm11 = vweird.f32 %v844_v32 }
 0x57a   : > { %v1431_v33 = vpop.eup %1430 }
 0x57b   : > { %v846_v34 = vmul.f32 %v1431_v33, %v844_v32  ;;  %vm852_vm10 = vweird.f32 %v1431_v33 }
 0x57c   : > { %vm853_vm12 = vmor %vm851_vm11, %vm852_vm10 }
 0x57d   : > { %v847_v35 = vmul.f32 %v1431_v33, %v846_v34 }
 0x57f   : > { %v848_v36 = vmul.f32 0.5, %v847_v35 }
 0x581   : > { %v849_v37 = vsub.f32 1.5, %v848_v36 }
 0x583   : > { %v850_v38 = vmul.f32 %v1431_v33, %v849_v37 }
 0x585   : > { %v854_v39 = vsel %vm853_vm12, %v1431_v33, %v850_v38 }
 0x586   : > { %v855_v40 = vmul.f32 %v854_v39, %v838_v22 }
 0x588   : > { %v856_v41 = vpack.c.bf16 %v855_v40, %v855_v40 }
 0x58a   : > { %1243 = vmatmul.msk.bf16.vlgmr.msra.gmra.mxu1 %vm462_vm1, %v856_v41 }
 0x607   : > { %v885_v43 = vpop.f32.mrf.mxu1 }
 0x608   : > { %v889_v44 = vmax.f32 %v885_v43, 0.0 }
 0x60a   : > { %v890_v45 = vpack.c.bf16 %v889_v44, %v889_v44 }
 0x60c   : > { %1260 = vmatmul.msk.bf16.vlgmr.msra.gmra.mxu3 %vm923_vm13, %v890_v45 }
 0x60f   : > { %v887_v46 = vpop.f32.mrf.mxu1 }
 0x68f   : > { %v936_v47 = vpop.f32.mrf.mxu3 }
 0x690   : > { %v937_v48 = vadd.f32 %v936_v47, %v855_v40 }
 0x692   : > { %v940_v49 = vsel %vm462_vm1, %v937_v48, 0.0 }
 0x693   : > { %941 = vadd.xlane.f32.xlu0 %v940_v49 }
 0x697   : > { %v938_v50 = vpop.f32.mrf.mxu3 }
 0x706   : > { %v942_v51 = vpop.xlane.xlu0 %941 }
 0x707   : > { %v943_v52 = vmul.f32 %v942_v51, %v1964_v20 }
 0x709   : > { %v944_v53 = vsub.f32 %v937_v48, %v943_v52 }
 0x70b   : > { %v945_v54 = vmul.f32 %v944_v53, %v944_v53 }
 0x70d   : > { %v946_v55 = vsel %vm462_vm1, %v945_v54, 0.0 }
 0x70e   : > { %947 = vadd.xlane.f32.xlu2 %v946_v55 }
 0x70f   : > { %1521 = shalt.err (!%p1518_p8)
}
 0x710   : > { %s1669_s10 = smov 128   ;;  %s1263_s26 = sshll.u32 %s1640_s8, 3 }
 0x711   : > { %1288 = dma.vmem_to_hbm [thread:$0]  (%p1825_p2), %s998_s16, 512, %s1000_s13, %s969_s18, %s1669_s10, %s1669_s10, %s1666_s24  }
 0x712   : > { %s2107_s12 = sld [smem:[#allocation30_spill]]  ;;  %s981_s24 = sshll.u32 %s1887_s23, 4  ;;  %s982_s24 = int_to_ptr.vmem [resolvable:$true] %s981_s24 }
 0x713   : > { %s964_s8 = scalar_lea.sflag [#allocation5], %s1850_s17 }
 0x718   : > { %s979_s15 = scalar_lea.hbm %s2107_s12, %s1263_s26  ;;  %s1542_s19 = scalar_lea.hbm %s2107_s12, 16 }
 0x719   : > { %s983_s14 = sshll.u32 %s979_s15, 4  ;;  %s984_s14 = int_to_ptr.hbm [resolvable:$true] %s983_s14 }
 0x71a   : > { %s1536_s16 = sshra.s32 %s984_s14, 4  ;;  %s1537_s16 = int_to_ptr.hbm [resolvable:$true] %s1536_s16 }
 0x71b   : > { %s1538_s13 = scalar_lea.hbm %s1537_s16, 8  ;;  %p1543_p9 = scmp.lt.s32.totalorder %s1537_s16, %s2107_s12 }
 0x71c   : > { %p1539_p2 = scmp.ne.s32.totalorder %s1537_s16, %s1538_s13  ;;  %p1544_p13 = scmp.lt.s32.totalorder %s1542_s19, %s1538_s13 }
 0x71e   : > { %p1540_p12 = pnand %p1539_p2, %p1798_p10  ;;  %p1545_p0 = por %p1544_p13, %p1543_p9 }
 0x720   : > { %p1541_p3 = pneg %p1540_p12 }
 0x722   : > { %p1546_p1 = pnand %p1545_p0, %p1541_p3 }
 0x781   : > { %v948_v57 = vpop.xlane.xlu2 %947 }
 0x782   : > { %v949_v58 = vmul.f32 %v948_v57, %v1964_v20 }
 0x784   : > { %v950_v59 = vadd.f32 1e-05, %v949_v58 }
 0x786   : > { %1432 = vrsqrt.f32 %v950_v59  ;;  %vm957_vm15 = vweird.f32 %v950_v59 }
 0x78c   : > { %v1433_v60 = vpop.eup %1432 }
 0x78d   : > { %v952_v61 = vmul.f32 %v1433_v60, %v950_v59  ;;  %vm958_vm14 = vweird.f32 %v1433_v60 }
 0x78e   : > { %vm959_vm0 = vmor %vm957_vm15, %vm958_vm14 }
 0x78f   : > { %v953_v56 = vmul.f32 %v1433_v60, %v952_v61 }
 0x791   : > { %v954_v62 = vmul.f32 0.5, %v953_v56 }
 0x793   : > { %v955_v63 = vsub.f32 1.5, %v954_v62 }
 0x795   : > { %v956_v0 = vmul.f32 %v1433_v60, %v955_v63 }
 0x797   : > { %v960_v1 = vsel %vm959_vm0, %v1433_v60, %v956_v0 }
 0x798   : > { %v961_v2 = vmul.f32 %v960_v1, %v944_v53 }
 0x79a   : > { %962 = vst.msk [vmem:[%s1887_s23] sm:$0xff] %vm462_vm1, %v961_v2 }
 0x79b   : > { %1549 = shalt.err (!%p1546_p1)
}
 0x79c   : > { %1287 = dma.vmem_to_hbm [thread:$0]  (%p1798_p10), %s982_s24, 128, %s984_s14, %s964_s8  }
 0x79d PF: > { %s2109_s17 = sld [smem:[#allocation17_spill]]  ;;  %p1306_p5 = scmp.ge.s32.totalorder %s1652_s11, 2 }
 0x79f   : > { %p1299_p6 = pnand %p1306_p5, %p1806_p11 }
 0x7a1   : > { %p1300_p7 = pneg %p1299_p6 }
 0x7a3   : > { %s1014_s6 = sand.u32 1, %s2109_s17  }
 0x7a4   : > { %s1015_s22 = scalar_lea.sflag [#allocation5], %s1014_s6 }
 0x7a5   : > { %1603 = dma.done.wait (%p1300_p7), %s1015_s22, 128  }
 0x7a6   : > { %1605 = vsyncadd (%p1300_p7), %s1015_s22, 4294967168  ;;  %s2111_s0 = sld [smem:[#allocation15_spill]]  ;;  %p1302_p8 = pnand %p1306_p5, %p1831_p4 }
 0x7a8   : > { %p1303_p2 = pneg %p1302_p8 }
 0x7ac   : > { %s1024_s10 = sand.u32 1, %s2111_s0  }
 0x7ad   : > { %s1025_s26 = scalar_lea.sflag [#allocation10], %s1024_s10 }
 0x7ae   : > { %1607 = dma.done.wait (%p1303_p2), %s1025_s26, 512  }
 0x7af   : > { %1609 = vsyncadd (%p1303_p2), %s1025_s26, 4294966784  ;;  %s30_s11 = sadd.s32 1, %s1652_s11   ;;  %s2113_s20 = sld [smem:[#allocation16_spill]] }
 0x7b0   : > { %p27_p10 = scmp.ge.s32.totalorder %s30_s11, 6   ;;  %s2114_s26 = sld [smem:[#allocation26_spill]] }
 0x7b1   : > { %s2115_s21 = sld [smem:[#allocation18_spill]]  ;;  %s2121_s24 = smov %s1616_s25 }
 0x7b2   : > { %s2116_s29 = sld [smem:[#allocation25_spill]]  ;;  %s2123_s27 = smov %s1628_s28 }
 0x7b3   : > { %s2117_s30 = sld [smem:[#allocation19_spill]]  ;;  %29 = sbr.rel (!%p27_p10) target bundleno = 17 (0x11), region = 138 }
 0x7b4   : > { %s2118_s8 = sld [smem:[#allocation20_spill]] }
 0x7b5   : > { %s2119_s9 = sld [smem:[#allocation21_spill]]  ;;  %s2122_s25 = smov %s2113_s20 }
 0x7b6   : > { %s2120_s10 = sld [smem:[#allocation22_spill]] }
 0x7b7   : > { %s2124_s28 = smov %s2115_s21 }
 0x7b8   :  { %1031 = vsyncpa [#allocation4], 1 }
 0x7b9   :  { %1033 = vsyncpa [#allocation4 + $0x1], 1 }
 0x7ba   :  { %1034 = vsyncpa [#allocation7], 1 }
 0x7bb   :  { %1036 = vsyncpa [#allocation7 + $0x1], 1 }
 0x7bc   :  { %1037 = vsyncpa [#allocation5], 1 }
 0x7bd   :  { %1039 = vsyncpa [#allocation5 + $0x1], 1 }
 0x7be   :  { %1040 = vsyncpa [#allocation10], 1 }
 0x7bf   :  { %1042 = vsyncpa [#allocation10 + $0x1], 1 }

</bundles_post_ra>
